<compile_context>
chip_gen: v6e
topology: v6e:2x2x1
jax: 0.10.0
libtpu: 0.0.40
codegen_flags: <defaults>
</compile_context>

<pallas_src>
import math
import functools

import jax
import jax.numpy as jnp
from jax.experimental import pallas as pl
from jax.experimental.pallas import tpu as pltpu


def _gcn_kernel(x_ref, h0_ref, zt_ref, wblk_ref, o_ref, *,
                alpha, theta, residual, tv_axis):
    """One grid step (TV on lanes everywhere).

      x_ref    : (nb*C, TV)   channels-major x      (bf16; f32 if residual)
      h0_ref   : (nb*C, tvb)  channels-major h0     (f32)
      zt_ref   : (TV, tvb)    (1 - alpha) * Z^T tile (bf16)
      wblk_ref : (g*C, g*C)   block-diag of (theta*W)^T (bf16)
      o_ref    : (nb*C, tvb)  transposed output tile
    """
    gc = wblk_ref.shape[0]
    tvb = o_ref.shape[1]
    nslabs = x_ref.shape[0] // gc

    x_blk = x_ref[...]
    # bf16 already on the non-residual path (cast done once in the wrapper).
    # On the residual path x is f32; with Z resident (tvb == TV) this cast
    # happens once per batch tile anyway.
    x_bf16 = x_blk if x_blk.dtype == jnp.bfloat16 else x_blk.astype(jnp.bfloat16)

    # hi^T, pre-scaled by (1 - alpha) (folded into zt in the wrapper):
    # one flattened (nb*C, TV) @ (TV, tvb) MXU matmul, f32 accumulation.
    hi = jnp.dot(x_bf16, zt_ref[...], preferred_element_type=jnp.float32)

    # support^T = (1 - alpha)*hi^T + alpha*h0^T   (f32 on the VPU).
    support = hi + alpha * h0_ref[...]

    if residual:
        if tvb == x_ref.shape[1]:
            x_res = x_blk
        else:
            start = pl.multiple_of(pl.program_id(tv_axis) * tvb, tvb)
            x_res = x_ref[:, pl.ds(start, tvb)]

    wblk = wblk_ref[...]
    sup_bf16 = support.astype(jnp.bfloat16)
    one_minus_theta = 1.0 - theta
    for s in range(nslabs):
        lo, up = s * gc, (s + 1) * gc
        # theta * (support @ W) for g batch elements in one full-K MXU push.
        mm = jnp.dot(wblk, sup_bf16[lo:up, :],
                     preferred_element_type=jnp.float32)
        # (1 - theta) * support pass-through added in f32 (better precision
        # than folding the identity into a bf16 effective weight).
        out_s = mm + one_minus_theta * support[lo:up, :]
        if residual:
            out_s = out_s + x_res[lo:up, :]
        o_ref[lo:up, :] = out_s.astype(o_ref.dtype)


def _largest_divisor_leq(n, cap):
    cap = int(max(1, min(n, cap)))
    for d in range(cap, 0, -1):
        if n % d == 0:
            return d
    return 1


def _divisors_desc(n):
    return [d for d in range(n, 0, -1) if n % d == 0]


def _vmem_capacity_bytes():
    try:
        return int(pltpu.get_tpu_info().vmem_capacity_bytes)
    except Exception:
        return 64 * 1024 * 1024        # conservative fallback (v7x per-TC VMEM)


def _mxu_k_width():
    # Target K width for block-diagonal packing of the second matmul.
    try:
        kind = jax.devices()[0].device_kind.lower()
    except Exception:
        return 256
    if any(t in kind for t in ("v2", "v3", "v4", "v5")):
        return 128                      # 128-wide MXU generations
    return 256                          # v6e / v7x


def graph_convolution(x, h0, Z, W, *, lamda, alpha, l, residual=False,
                      batch_block=None, tv_block=None):
    """x: (N, C, T, V); h0: (N, T*V, C); Z: (T*V, T*V); W: (C, Cout).
    Returns (N, T*V, Cout), matching the PyTorch module."""
    N, C, T, V = x.shape
    TV = T * V
    Cin, Cout = W.shape
    if Cin != C:
        raise ValueError("W.shape[0] must equal in_channels")
    if Cout != C:
        # The module's `(1 - theta) * support` add only broadcasts correctly
        # when out_features == in_features -- make that explicit.
        raise ValueError("out_features must equal in_features (GCNII blend)")
    if h0.shape != (N, TV, C):
        raise ValueError("h0 must have shape (N, T*V, C)")
    if C % 8 != 0:
        # TODO(synk): pad channels to a multiple of 8 to support arbitrary C.
        raise ValueError("in_channels must be a multiple of 8 for this kernel")

    theta = math.log(lamda / l + 1.0)
    out_dtype = x.dtype

    # ---- parameters prepared once in the wrapper --------------------------
    zt = ((1.0 - alpha) * Z.T).astype(jnp.bfloat16)                # (TV, TV)

    # ---- data layout: channels-major, TV on lanes --------------------------
    # x needs no transpose at all (free reshape of contiguous (N, C, T, V)).
    x_compute_dtype = out_dtype if residual else jnp.bfloat16
    x2 = x.reshape(N * C, TV).astype(x_compute_dtype)
    # TODO(synk): if the surrounding model consumes channels-major activations,
    # the h0 / output transposes below can be dropped entirely.
    h0_2 = jnp.transpose(h0, (0, 2, 1)).reshape(N * C, TV).astype(jnp.float32)

    x_itm = jnp.dtype(x_compute_dtype).itemsize
    h_itm = 4
    o_itm = jnp.dtype(out_dtype).itemsize

    # ---- per-generation VMEM budget & tile selection ------------------------
    capacity = _vmem_capacity_bytes()
    budget = min(capacity - (8 << 20), int(0.8 * capacity))
    mxu_k = _mxu_k_width()

    def g_for(nb):
        return _largest_divisor_leq(nb, max(1, mxu_k // C))

    def need_bytes(nb, tvb):
        gc = g_for(nb) * C
        # Every block is double-buffered by the Pallas pipeline (factor 2 once).
        return 2 * (nb * C * TV * x_itm        # x block (full TV: K dim)
                    + nb * C * tvb * h_itm     # h0 block
                    + TV * tvb * 2             # Z^T tile (bf16)
                    + gc * gc * 2              # block-diag weight (bf16)
                    + nb * C * tvb * o_itm)    # output block

    if batch_block is not None:
        if N % int(batch_block) != 0:
            raise ValueError("batch_block must divide N")
        nb_candidates = [int(batch_block)]
    else:
        cap_nb = max(1, 1024 // C)             # target nb*C ~ 1024 rows
        nb_candidates = [d for d in _divisors_desc(N) if d <= cap_nb] or [1]

    if tv_block is not None:
        if TV % int(tv_block) != 0:
            raise ValueError("tv_block must divide T*V")
        tvb_candidates = [int(tv_block)]
    elif TV % 128 == 0:
        # Prefer the full TV (Z^T stays resident); fall back to 128-multiples.
        tvb_candidates = [TV] + [128 * d for d in _divisors_desc(TV // 128)
                                 if 128 * d < TV]
    else:
        tvb_candidates = [TV]

    nb, tvb = nb_candidates[-1], tvb_candidates[-1]
    found = False
    for tvb_c in tvb_candidates:               # shrink nb before shrinking tvb
        for nb_c in nb_candidates:
            if need_bytes(nb_c, tvb_c) <= budget:
                nb, tvb, found = nb_c, tvb_c, True
                break
        if found:
            break

    g = g_for(nb)
    gc = g * C
    need = need_bytes(nb, tvb)
    vmem_limit = int(min(max(32 << 20, need + (8 << 20)), capacity - (4 << 20)))

    wblk = jnp.kron(jnp.eye(g, dtype=jnp.float32),
                    (theta * W.astype(jnp.float32)).T).astype(jnp.bfloat16)

    # ---- grid order: put the cheaper-to-re-stream operand on the inner axis --
    gb, gt = N // nb, TV // tvb
    if gt > 1 and gb > 1:
        z_restream = gb * TV * TV * 2          # batch-outer: Z refetched per i
        x_restream = gt * N * C * TV * x_itm   # tv-outer: x refetched per j
        batch_outer = z_restream <= x_restream
    else:
        batch_outer = True

    if batch_outer:
        grid = (gb, gt)
        tv_axis = 1
        x_map = lambda i, j: (i, 0)
        h_map = lambda i, j: (i, j)
        z_map = lambda i, j: (0, j)
        w_map = lambda i, j: (0, 0)
        o_map = lambda i, j: (i, j)
        dims = ("parallel", "arbitrary")       # megacore shards batch tiles
    else:
        grid = (gt, gb)
        tv_axis = 0
        x_map = lambda j, i: (i, 0)
        h_map = lambda j, i: (i, j)
        z_map = lambda j, i: (0, j)
        w_map = lambda j, i: (0, 0)
        o_map = lambda j, i: (i, j)
        dims = ("arbitrary", "parallel")

    # ---- cost estimate (useful flops; bytes incl. re-streamed operands) -----
    x_fetches = 1 if batch_outer else gt
    z_fetches = gb if (batch_outer and gt > 1) else 1
    flops = int(2 * N * C * TV * TV + 2 * N * C * C * TV)
    bytes_accessed = int(x_fetches * N * C * TV * x_itm
                         + N * C * TV * h_itm
                         + N * C * TV * o_itm
                         + z_fetches * TV * TV * 2
                         + gc * gc * 2)

    kernel = functools.partial(_gcn_kernel, alpha=float(alpha),
                               theta=float(theta), residual=bool(residual),
                               tv_axis=tv_axis)

    out2 = pl.pallas_call(
        kernel,
        out_shape=jax.ShapeDtypeStruct((N * C, TV), out_dtype),
        grid_spec=pltpu.PrefetchScalarGridSpec(
            num_scalar_prefetch=0,
            grid=grid,
            in_specs=[
                pl.BlockSpec((nb * C, TV), x_map),     # x (full TV: K dim)
                pl.BlockSpec((nb * C, tvb), h_map),    # h0
                pl.BlockSpec((TV, tvb), z_map),        # (1 - alpha) * Z^T tile
                pl.BlockSpec((gc, gc), w_map),         # block-diag (theta*W)^T
            ],
            out_specs=pl.BlockSpec((nb * C, tvb), o_map),
        ),
        compiler_params=pltpu.CompilerParams(
            dimension_semantics=dims,
            vmem_limit_bytes=vmem_limit,
        ),
        cost_estimate=pl.CostEstimate(flops=flops, transcendentals=0,
                                      bytes_accessed=bytes_accessed),
    )(x2, h0_2, zt, wblk)

    # Back to the module's (N, T*V, Cout) layout (free reshape + one transpose).
    return jnp.transpose(out2.reshape(N, Cout, TV), (0, 2, 1))


def _reference(x, h0, Z, W, *, lamda, alpha, l, residual=False):
    N, C, T, V = x.shape
    TV = T * V
    theta = math.log(lamda / l + 1.0)
    xp = jnp.transpose(x.reshape(N, C, TV), (0, 2, 1))          # (N, TV, C)
    hi = jnp.einsum("jk,nkc->njc", Z, xp)
    support = (1.0 - alpha) * hi + alpha * h0
    out = theta * (support @ W) + (1.0 - theta) * support
    if residual:
        out = out + xp
    return out


if __name__ == "__main__":
    # Small skeleton-graph-like shapes: T*V = 128 so TV is the lane-dense last
    # dim inside the kernel; in_features == out_features == C (module requires it).
    N, C, T, V = 4, 32, 8, 16
    TV = T * V
    in_features = out_features = C

    key = jax.random.PRNGKey(0)
    kx, kh, kz, kw = jax.random.split(key, 4)

    x = jax.random.normal(kx, (N, C, T, V), dtype=jnp.float32)
    h0 = jax.random.normal(kh, (N, TV, C), dtype=jnp.float32)

    # Deterministic parameter init (Z is uninitialized in torch; weight is
    # uniform(-stdv, stdv) per reset_parameters).
    stdv = 1.0 / math.sqrt(out_features)
    Z = jax.random.normal(kz, (TV, TV), dtype=jnp.float32) * 0.1
    W = jax.random.uniform(kw, (in_features, out_features), dtype=jnp.float32,
                           minval=-stdv, maxval=stdv)

    lamda, alpha, l = 0.5, 0.1, 1

    out = graph_convolution(x, h0, Z, W, lamda=lamda, alpha=alpha, l=l)
    out = jax.block_until_ready(out)

    ref = _reference(x, h0, Z, W, lamda=lamda, alpha=alpha, l=l)
    assert out.shape == (N, TV, out_features)

    # bf16 MXU operands (f32 accumulation) -> tolerance looser than pure f32.
    rel_l2 = jnp.linalg.norm(out - ref) / jnp.linalg.norm(ref)
    assert rel_l2 < 2e-2, f"relative L2 error too large: {rel_l2}"
    assert jnp.allclose(out, ref, atol=5e-2, rtol=5e-2), \
        f"mismatch vs reference (max abs err {jnp.max(jnp.abs(out - ref))})"

    print("KERNEL_OK")
</pallas_src>

<mosaic_0001>
module attributes {stable_mosaic.version = 11 : i64} {
  func.func @_gcn_kernel(%arg0: i32, %arg1: i32, %arg2: memref<128x128xbf16, #tpu.memory_space<vmem>>, %arg3: memref<128x128xf32, #tpu.memory_space<vmem>>, %arg4: memref<128x128xbf16, #tpu.memory_space<vmem>>, %arg5: memref<128x128xbf16, #tpu.memory_space<vmem>>, %arg6: memref<128x128xf32, #tpu.memory_space<vmem>>) attributes {dimension_semantics = [#tpu.dimension_semantics<parallel>, #tpu.dimension_semantics<arbitrary>], iteration_bounds = array<i64: 1, 1>, scalar_prefetch = 0 : i64, scratch_operands = 0 : i64, tpu.core_type = #tpu.core_type<tc>, window_params = [{transform_indices = @transform_0, window_bounds = array<i64: 128, 128>}, {transform_indices = @transform_1, window_bounds = array<i64: 128, 128>}, {transform_indices = @transform_2, window_bounds = array<i64: 128, 128>}, {pipeline_mode = #tpu.pipeline_mode<synchronous>, transform_indices = @transform_3, window_bounds = array<i64: 128, 128>}, {transform_indices = @transform_4, window_bounds = array<i64: 128, 128>}]} {
    %c0 = arith.constant 0 : index
    %c0_0 = arith.constant 0 : index
    %0 = vector.load %arg2[%c0, %c0_0] : memref<128x128xbf16, #tpu.memory_space<vmem>>, vector<128x128xbf16>
    %c0_1 = arith.constant 0 : index
    %c0_2 = arith.constant 0 : index
    %1 = vector.load %arg4[%c0_1, %c0_2] : memref<128x128xbf16, #tpu.memory_space<vmem>>, vector<128x128xbf16>
    %cst = arith.constant dense<0.000000e+00> : vector<128x128xf32>
    %2 = tpu.matmul %0, %1, %cst {dimension_numbers = #tpu.dot_dimension_numbers<[1], [0], [0], [1], [0, 0, 1, 1], [], []>} : vector<128x128xbf16>, vector<128x128xbf16>, vector<128x128xf32> -> vector<128x128xf32>
    %c0_3 = arith.constant 0 : index
    %c0_4 = arith.constant 0 : index
    %3 = vector.load %arg3[%c0_3, %c0_4] : memref<128x128xf32, #tpu.memory_space<vmem>>, vector<128x128xf32>
    %cst_5 = arith.constant 1.000000e-01 : f32
    %4 = vector.broadcast %cst_5 : f32 to vector<128x128xf32>
    %5 = arith.mulf %4, %3 : vector<128x128xf32>
    %6 = arith.addf %2, %5 : vector<128x128xf32>
    %c0_6 = arith.constant 0 : index
    %c0_7 = arith.constant 0 : index
    %7 = vector.load %arg5[%c0_6, %c0_7] : memref<128x128xbf16, #tpu.memory_space<vmem>>, vector<128x128xbf16>
    %8 = arith.truncf %6 : vector<128x128xf32> to vector<128x128xbf16>
    %cst_8 = arith.constant dense<0.000000e+00> : vector<128x128xf32>
    %9 = tpu.matmul %7, %8, %cst_8 {dimension_numbers = #tpu.dot_dimension_numbers<[1], [0], [0], [1], [0, 0, 1, 1], [], []>} : vector<128x128xbf16>, vector<128x128xbf16>, vector<128x128xf32> -> vector<128x128xf32>
    %cst_9 = arith.constant 0.594534874 : f32
    %10 = vector.broadcast %cst_9 : f32 to vector<128x128xf32>
    %11 = arith.mulf %10, %6 : vector<128x128xf32>
    %12 = arith.addf %9, %11 : vector<128x128xf32>
    %c0_10 = arith.constant 0 : index
    %c0_11 = arith.constant 0 : index
    %13 = vector.load %arg6[%c0_10, %c0_11] : memref<128x128xf32, #tpu.memory_space<vmem>>, vector<128x128xf32>
    tpu.vector_store %arg6[%c0_10, %c0_11], %12 {strides = array<i32>} : memref<128x128xf32, #tpu.memory_space<vmem>>, vector<128x128xf32>,
    return
  }
  func.func @transform_0(%arg0: i32, %arg1: i32) -> (i32, i32) {
    %c0_i32 = arith.constant 0 : i32
    %c0_i32_0 = arith.constant 0 : i32
    return %arg0, %c0_i32 : i32, i32
  }
  func.func @transform_1(%arg0: i32, %arg1: i32) -> (i32, i32) {
    %c0_i32 = arith.constant 0 : i32
    return %arg0, %arg1 : i32, i32
  }
  func.func @transform_2(%arg0: i32, %arg1: i32) -> (i32, i32) {
    %c0_i32 = arith.constant 0 : i32
    %c0_i32_0 = arith.constant 0 : i32
    return %c0_i32, %arg1 : i32, i32
  }
  func.func @transform_3(%arg0: i32, %arg1: i32) -> (i32, i32) {
    %c0_i32 = arith.constant 0 : i32
    %c0_i32_0 = arith.constant 0 : i32
    %c0_i32_1 = arith.constant 0 : i32
    return %c0_i32, %c0_i32_0 : i32, i32
  }
  func.func @transform_4(%arg0: i32, %arg1: i32) -> (i32, i32) {
    %c0_i32 = arith.constant 0 : i32
    return %arg0, %arg1 : i32, i32
  }
}

</mosaic_0001>

<bundles_post_ra>
// kernel: tpu_custom_call.1
= control target key start
LH: loop header
LB: loop body
LE: loop exit
PB: predicated region body
PF: predicated region fallthrough
CT: control target
= control target key end

     0   :  { %9 = vsyncpa [#allocation3], 0  ;;  %s922_s0 = inlined_call_operand.hbm [shape: bf16[128,128], index: 0, kind: input, shape index: {}]   ;;  %s923_s1 = inlined_call_operand.hbm [shape: f32[128,128], index: 1, kind: input, shape index: {}]   ;;  %s924_s2 = inlined_call_operand.hbm [shape: bf16[128,128], index: 2, kind: input, shape index: {}]   ;;  %s925_s3 = inlined_call_operand.hbm [shape: bf16[128,128], index: 3, kind: input, shape index: {}]   ;;  %s926_s4 = inlined_call_operand.hbm [shape: f32[128,128], index: 4, kind: output, shape index: {}]  }
   0x1   :  { %10 = vsyncpa [#allocation6], 0 }
   0x2   :  { %11 = vsyncpa [#allocation9], 0 }
   0x3   :  { %12 = vsyncpa [#allocation4], 0  ;;  %s812_s15 = smov [#allocation5]  }
   0x4   :  { %s30_s16 = sshll.u32 %s812_s15, 4  ;;  %s31_s16 = int_to_ptr.vmem [resolvable:$true] %s30_s16 }
   0x5   :  { %s712_s17 = scalar_lea.vmem %s31_s16, 2048  ;;  %p717_p1 = scmp.lt.s32.totalorder %s31_s16, %s31_s16 }
   0x6   :  { %p713_p0 = scmp.ne.s32.totalorder %s31_s16, %s712_s17  ;;  %p718_p2 = scmp.lt.s32.totalorder %s712_s17, %s712_s17 }
   0x8   :  { %p719_p3 = por %p718_p2, %p717_p1 }
   0xa   :  { %p720_p4 = pnand %p719_p3, %p713_p0 }
   0xc   :  { %723 = shalt.err (!%p720_p4)
}
   0xd   :  { %s813_s18 = smov 128   ;;  %s814_s19 = smov 8  }
   0xe   :  { %36 = dma.hbm_to_vmem [thread:$0]  %s923_s1, 2048, %s31_s16, [#allocation6], %s813_s18, %s813_s18, %s814_s19  }
   0xf   :  { %s815_s22 = smov [#allocation2]  }
  0x10   :  { %s18_s23 = sshll.u32 %s815_s22, 4  ;;  %s19_s23 = int_to_ptr.vmem [resolvable:$true] %s18_s23 }
  0x11   :  { %s732_s24 = scalar_lea.vmem %s19_s23, 1024  ;;  %p737_p6 = scmp.lt.s32.totalorder %s19_s23, %s19_s23 }
  0x12   :  { %p733_p5 = scmp.ne.s32.totalorder %s19_s23, %s732_s24  ;;  %p738_p7 = scmp.lt.s32.totalorder %s732_s24, %s732_s24 }
  0x14   :  { %p739_p8 = por %p738_p7, %p737_p6 }
  0x16   :  { %p740_p9 = pnand %p739_p8, %p733_p5 }
  0x18   :  { %743 = shalt.err (!%p740_p9)
}
  0x19   :  { %s816_s25 = smov 64   ;;  %s817_s26 = smov 4  }
  0x1a   :  { %24 = dma.hbm_to_vmem [thread:$0]  %s922_s0, 1024, %s19_s23, [#allocation3], %s816_s25, %s816_s25, %s817_s26  }
  0x1b   :  { %s818_s29 = smov [#allocation7]   ;;  %s819_s5 = smov [#allocation8]  }
  0x1c   :  { %s42_s30 = sshll.u32 %s818_s29, 4  ;;  %s54_s1 = sshll.u32 %s819_s5, 4  ;;  %s43_s30 = int_to_ptr.vmem [resolvable:$true] %s42_s30  ;;  %s55_s1 = int_to_ptr.vmem [resolvable:$true] %s54_s1 }
  0x1d   :  { %s752_s6 = scalar_lea.vmem %s43_s30, 1024  ;;  %p757_p11 = scmp.lt.s32.totalorder %s43_s30, %s43_s30 }
  0x1e   :  { %p753_p10 = scmp.ne.s32.totalorder %s43_s30, %s752_s6  ;;  %p758_p12 = scmp.lt.s32.totalorder %s752_s6, %s752_s6 }
  0x20   :  { %p759_p13 = por %p758_p12, %p757_p11 }
  0x22   :  { %p760_p0 = pnand %p759_p13, %p753_p10 }
  0x24   :  { %763 = shalt.err (!%p760_p0)
}
  0x25   :  { %48 = dma.hbm_to_vmem [thread:$0]  %s924_s2, 1024, %s43_s30, [#allocation6], %s816_s25, %s816_s25, %s817_s26  }
  0x26   :  { %s772_s9 = scalar_lea.vmem %s55_s1, 1024  ;;  %p777_p2 = scmp.lt.s32.totalorder %s55_s1, %s55_s1 }
  0x27   :  { %p773_p1 = scmp.ne.s32.totalorder %s55_s1, %s772_s9  ;;  %p778_p3 = scmp.lt.s32.totalorder %s772_s9, %s772_s9 }
  0x29   :  { %p779_p4 = por %p778_p3, %p777_p2 }
  0x2b   :  { %p780_p5 = pnand %p779_p4, %p773_p1 }
  0x2d   :  { %783 = shalt.err (!%p780_p5)
}
  0x2e   :  { %60 = dma.hbm_to_vmem [thread:$0]  %s925_s3, 1024, %s55_s1, [#allocation9], %s816_s25, %s816_s25, %s817_s26  }
  0x2f   :  { %804 = dma.done.wait [#allocation3], 1024  }
  0x30   :  { %805 = vsyncadd [#allocation3], 4294966272 }
  0x31   :  { %806 = dma.done.wait [#allocation6], 3072  }
  0x32   :  { %807 = vsyncadd [#allocation6], 4294964224 }
  0x33   :  { %808 = dma.done.wait [#allocation9], 1024  }
  0x34   :  { %809 = vsyncadd [#allocation9], 4294966272  ;;  %v680_v0 = vld [vmem:[#allocation7 + $0x38] sm:$0xff]   ;;  %v681_v1 = vld [vmem:[#allocation7 + $0x30] sm:$0xff]   ;;  %s820_s2 = smov [#allocation10]  }
  0x35   :  { %607 = vmatprep.subr.bf16.mxu0 %v680_v0  ;;  %v682_v2 = vld [vmem:[#allocation7 + $0x28] sm:$0xff]   ;;  %v683_v3 = vld [vmem:[#allocation7 + $0x20] sm:$0xff]   ;;  %v684_v5 = vld [vmem:[#allocation7 + $0x18] sm:$0xff]   ;;  %s537_s3 = sshll.u32 %s820_s2, 4  ;;  %s538_s3 = int_to_ptr.vmem [resolvable:$true] %s537_s3 }
  0x36   :  { %608 = vmatpush3.bf16.msra.mxu0 %v680_v0  ;;  %v688_v4 = vld [vmem:[#allocation2] sm:$0xff]   ;;  %v685_v6 = vld [vmem:[#allocation7 + $0x10] sm:$0xff]   ;;  %v686_v7 = vld [vmem:[#allocation7 + $0x8] sm:$0xff]   ;;  %s784_s11 = scalar_lea.vmem %s538_s3, 2048  ;;  %p789_p7 = scmp.lt.s32.totalorder %s538_s3, %s538_s3 }
  0x37   :  { %609 = vmatprep.subr.bf16.mxu0 %v681_v1  ;;  %623 = vmatprep.mubr.bf16.mxu0 %v688_v4  ;;  %v687_v8 = vld [vmem:[#allocation7] sm:$0xff]   ;;  %v689_v9 = vld [vmem:[#allocation2 + $0x8] sm:$0xff]   ;;  %v690_v10 = vld [vmem:[#allocation2 + $0x10] sm:$0xff]   ;;  %p785_p6 = scmp.ne.s32.totalorder %s538_s3, %s784_s11  ;;  %p790_p8 = scmp.lt.s32.totalorder %s784_s11, %s784_s11 }
  0x38   :  { %v691_v11 = vld [vmem:[#allocation2 + $0x18] sm:$0xff]   ;;  %v692_v12 = vld [vmem:[#allocation2 + $0x20] sm:$0xff]   ;;  %v693_v13 = vld [vmem:[#allocation2 + $0x28] sm:$0xff]  }
  0x39   :  { %v694_v14 = vld [vmem:[#allocation2 + $0x30] sm:$0xff]   ;;  %v695_v15 = vld [vmem:[#allocation2 + $0x38] sm:$0xff]   ;;  %v696_v16 = vld [vmem:[#allocation8] sm:$0xff]   ;;  %p791_p9 = por %p790_p8, %p789_p7 }
  0x3a   :  { %610 = vmatpush3.bf16.msra.mxu0 %v681_v1  ;;  %655 = vmatprep.mubr.bf16.mxu1 %v696_v16  ;;  %v120_v29 = vld [vmem:[#allocation5 + $0x70] sm:$0xff]  ;;  %v121_v30 = vld [vmem:[#allocation5 + $0x78] sm:$0xff]  ;;  %v118_v32 = vld [vmem:[#allocation5 + $0x60] sm:$0xff] }
  0x3b   :  { %611 = vmatprep.subr.bf16.mxu0 %v682_v2  ;;  %v119_v33 = vld [vmem:[#allocation5 + $0x68] sm:$0xff]  ;;  %v136_v34 = vmul.f32 0.1, %v120_v29  ;;  %v137_v35 = vmul.f32 0.1, %v121_v30  ;;  %v117_v36 = vld [vmem:[#allocation5 + $0x58] sm:$0xff]  ;;  %p792_p10 = pnand %p791_p9, %p785_p6 }
  0x3c   :  { %v134_v38 = vmul.f32 0.1, %v118_v32  ;;  %v135_v39 = vmul.f32 0.1, %v119_v33  ;;  %v116_v40 = vld [vmem:[#allocation5 + $0x50] sm:$0xff]  ;;  %v115_v45 = vld [vmem:[#allocation5 + $0x48] sm:$0xff] }
  0x3d   :  { %v133_v42 = vmul.f32 0.1, %v117_v36  ;;  %v132_v47 = vmul.f32 0.1, %v116_v40  ;;  %v114_v51 = vld [vmem:[#allocation5 + $0x40] sm:$0xff]  ;;  %v113_v55 = vld [vmem:[#allocation5 + $0x38] sm:$0xff] }
  0x3e   :  { %612 = vmatpush3.bf16.msra.mxu0 %v682_v2  ;;  %v131_v53 = vmul.f32 0.1, %v115_v45  ;;  %v130_v57 = vmul.f32 0.1, %v114_v51  ;;  %v112_v58 = vld [vmem:[#allocation5 + $0x30] sm:$0xff]  ;;  %v111_v62 = vld [vmem:[#allocation5 + $0x28] sm:$0xff] }
  0x3f   :  { %613 = vmatprep.subr.bf16.mxu0 %v683_v3  ;;  %v129_v59 = vmul.f32 0.1, %v113_v55  ;;  %v128_v63 = vmul.f32 0.1, %v112_v58  ;;  %v110_v1 = vld [vmem:[#allocation5 + $0x20] sm:$0xff]  ;;  %v697_v29 = vld [vmem:[#allocation8 + $0x8] sm:$0xff]  }
  0x40   :  { %v699_v30 = vld [vmem:[#allocation8 + $0x18] sm:$0xff]   ;;  %v702_v32 = vld [vmem:[#allocation8 + $0x30] sm:$0xff]  }
  0x42   :  { %614 = vmatpush3.bf16.msra.mxu0 %v683_v3  ;;  %v127_v3 = vmul.f32 0.1, %v111_v62 }
  0x43   :  { %615 = vmatprep.subr.bf16.mxu0 %v684_v5 }
  0x46   :  { %616 = vmatpush3.bf16.msra.mxu0 %v684_v5  ;;  %v109_v5 = vld [vmem:[#allocation5 + $0x18] sm:$0xff] }
  0x47   :  { %617 = vmatprep.subr.bf16.mxu0 %v685_v6 }
  0x4a   :  { %618 = vmatpush3.bf16.msra.mxu0 %v685_v6 }
  0x4b   :  { %619 = vmatprep.subr.bf16.mxu0 %v686_v7 }
  0x4e   :  { %620 = vmatpush3.bf16.msra.mxu0 %v686_v7  ;;  %v126_v7 = vmul.f32 0.1, %v110_v1 }
  0x4f   :  { %621 = vmatprep.subr.bf16.mxu0 %v687_v8 }
  0x52   :  { %622 = vmatpush3.bf16.msra.mxu0 %v687_v8  ;;  %v108_v8 = vld [vmem:[#allocation5 + $0x10] sm:$0xff] }
  0x55   :  { %624 = vmatmul.mubr.bf16.vlgmr.msra.gmra.mxu0 %v689_v9  ;;  %v125_v9 = vmul.f32 0.1, %v109_v5 }
  0x56   :  { %627 = vmatprep.mubr.bf16.mxu0 %v690_v10 }
  0x5d   :  { %628 = vmatmul.mubr.bf16.gmra.mxu0 %v691_v11 }
  0x5e   :  { %631 = vmatprep.mubr.bf16.mxu0 %v692_v12  ;;  %v107_v12 = vld [vmem:[#allocation5 + $0x8] sm:$0xff] }
  0x65   :  { %632 = vmatmul.mubr.bf16.gmra.mxu0 %v693_v13  ;;  %v124_v13 = vmul.f32 0.1, %v108_v8 }
  0x66   :  { %635 = vmatprep.mubr.bf16.mxu0 %v694_v14 }
  0x6d   :  { %636 = vmatmul.mubr.bf16.gmra.mxu0 %v695_v15  ;;  %v106_v15 = vld [vmem:[#allocation5] sm:$0xff] }
 0x115   :  { %v861_v17 = vpop.f32.mrf.mxu0 }
 0x117   :  { %v863_v18 = vpop.f32.mrf.mxu0 }
 0x119   :  { %v865_v19 = vpop.f32.mrf.mxu0 }
 0x11a   :  { %v280_v16 = vadd.f32 %v865_v19, %v125_v9  ;;  %v698_v19 = vld [vmem:[#allocation8 + $0x10] sm:$0xff]  }
 0x11b   :  { %v867_v20 = vpop.f32.mrf.mxu0 }
 0x11d   :  { %v629_v21 = vpop.f32.mrf.mxu0 }
 0x11e   :  { %v293_v6 = vadd.f32 %v629_v21, %v128_v63 }
 0x11f   :  { %v869_v22 = vpop.f32.mrf.mxu0 }
 0x120   :  { %v285_v14 = vadd.f32 %v869_v22, %v126_v7 }
 0x121   :  { %v630_v23 = vpop.f32.mrf.mxu0 }
 0x122   :  { %v893_v2 = vadd.f32 %v630_v23, %v129_v59  ;;  %v123_v23 = vmul.f32 0.1, %v107_v12  ;;  %v359_v51 = vmul.f32 0.5945349, %v285_v14 }
 0x123   :  { %v287_v24 = vpop.f32.mrf.mxu0 }
 0x124   :  { %v350_v10 = vpack.c.bf16 %v893_v2, %v293_v6  ;;  %v898_v11 = vadd.f32 %v287_v24, %v127_v3  ;;  %v272_v24 = vadd.f32 %v867_v20, %v123_v23  ;;  %v703_v20 = vld [vmem:[#allocation8 + $0x38] sm:$0xff]   ;;  %v362_v55 = vmul.f32 0.5945349, %v893_v2 }
 0x125   :  { %v633_v25 = vpop.f32.mrf.mxu0 }
 0x126   :  { %v885_v56 = vadd.f32 %v633_v25, %v132_v47  ;;  %v349_v21 = vpack.c.bf16 %v898_v11, %v285_v14  ;;  %v277_v25 = vadd.f32 %v861_v17, %v124_v13  ;;  %v701_v17 = vld [vmem:[#allocation8 + $0x28] sm:$0xff]   ;;  %v360_v59 = vmul.f32 0.5945349, %v898_v11 }
 0x127   :  { %v300_v26 = vpop.f32.mrf.mxu0 }
 0x128   :  { %v891_v0 = vadd.f32 %v300_v26, %v130_v57  ;;  %v122_v26 = vmul.f32 0.1, %v106_v15  ;;  %v365_v63 = vmul.f32 0.5945349, %v885_v56 }
 0x129   :  { %v634_v27 = vpop.f32.mrf.mxu0 }
 0x12a   :  { %v881_v52 = vadd.f32 %v634_v27, %v133_v42  ;;  %v348_v27 = vpack.c.bf16 %v280_v16, %v277_v25 }
 0x12b   :  { %v303_v28 = vpop.f32.mrf.mxu0 }
 0x12c   :  { %v352_v60 = vpack.c.bf16 %v881_v52, %v885_v56  ;;  %v889_v61 = vadd.f32 %v303_v28, %v131_v53  ;;  %v269_v28 = vadd.f32 %v863_v18, %v122_v26  ;;  %v357_v18 = vmul.f32 0.5945349, %v277_v25 }
 0x12d   :  { %v637_v31 = vpop.f32.mrf.mxu0  ;;  %v366_v2 = vmul.f32 0.5945349, %v881_v52 }
 0x12e   :  { %v871_v43 = vadd.f32 %v637_v31, %v136_v34  ;;  %v351_v4 = vpack.c.bf16 %v889_v61, %v891_v0  ;;  %v347_v22 = vpack.c.bf16 %v272_v24, %v269_v28  ;;  %v700_v31 = vld [vmem:[#allocation8 + $0x20] sm:$0xff]   ;;  %v364_v9 = vmul.f32 0.5945349, %v889_v61 }
 0x12f   :  { %v316_v37 = vpop.f32.mrf.mxu0 }
 0x130   :  { %v875_v48 = vadd.f32 %v316_v37, %v134_v38  ;;  %v358_v38 = vmul.f32 0.5945349, %v280_v16  ;;  %v369_v56 = vmul.f32 0.5945349, %v871_v43 }
 0x131   :  { %v638_v41 = vpop.f32.mrf.mxu0 }
 0x132   :  { %v873_v44 = vadd.f32 %v638_v41, %v137_v35  ;;  %v355_v35 = vmul.f32 0.5945349, %v269_v28  ;;  %v356_v41 = vmul.f32 0.5945349, %v272_v24 }
 0x133   :  { %v319_v46 = vpop.f32.mrf.mxu0 }
 0x134   :  { %v877_v49 = vadd.f32 %v319_v46, %v135_v39  ;;  %v354_v50 = vpack.c.bf16 %v873_v44, %v871_v43  ;;  %v361_v46 = vmul.f32 0.5945349, %v293_v6  ;;  %v370_v52 = vmul.f32 0.5945349, %v873_v44 }
 0x136   :  { %v353_v54 = vpack.c.bf16 %v877_v49, %v875_v48  ;;  %639 = vmatprep.subr.bf16.mxu1 %v354_v50  ;;  %v368_v23 = vmul.f32 0.5945349, %v877_v49 }
 0x137   :  { %640 = vmatpush3.bf16.msra.mxu1 %v354_v50 }
 0x138   :  { %641 = vmatprep.subr.bf16.mxu1 %v353_v54 }
 0x13b   :  { %642 = vmatpush3.bf16.msra.mxu1 %v353_v54 }
 0x13c   :  { %643 = vmatprep.subr.bf16.mxu1 %v352_v60 }
 0x13f   :  { %644 = vmatpush3.bf16.msra.mxu1 %v352_v60 }
 0x140   :  { %645 = vmatprep.subr.bf16.mxu1 %v351_v4 }
 0x143   :  { %646 = vmatpush3.bf16.msra.mxu1 %v351_v4  ;;  %v363_v4 = vmul.f32 0.5945349, %v891_v0  ;;  %v367_v0 = vmul.f32 0.5945349, %v875_v48 }
 0x144   :  { %647 = vmatprep.subr.bf16.mxu1 %v350_v10 }
 0x147   :  { %648 = vmatpush3.bf16.msra.mxu1 %v350_v10 }
 0x148   :  { %649 = vmatprep.subr.bf16.mxu1 %v349_v21 }
 0x14b   :  { %650 = vmatpush3.bf16.msra.mxu1 %v349_v21 }
 0x14c   :  { %651 = vmatprep.subr.bf16.mxu1 %v348_v27 }
 0x14f   :  { %652 = vmatpush3.bf16.msra.mxu1 %v348_v27 }
 0x150   :  { %653 = vmatprep.subr.bf16.mxu1 %v347_v22 }
 0x153   :  { %654 = vmatpush3.bf16.msra.mxu1 %v347_v22 }
 0x156   :  { %656 = vmatmul.mubr.bf16.vlgmr.msra.gmra.mxu1 %v697_v29 }
 0x157   :  { %659 = vmatprep.mubr.bf16.mxu1 %v698_v19 }
 0x15e   :  { %660 = vmatmul.mubr.bf16.gmra.mxu1 %v699_v30 }
 0x15f   :  { %663 = vmatprep.mubr.bf16.mxu1 %v700_v31 }
 0x166   :  { %664 = vmatmul.mubr.bf16.gmra.mxu1 %v701_v17 }
 0x167   :  { %667 = vmatprep.mubr.bf16.mxu1 %v702_v32 }
 0x16e   :  { %668 = vmatmul.mubr.bf16.gmra.mxu1 %v703_v20 }
 0x216   :  { %v657_v33 = vpop.f32.mrf.mxu1 }
 0x217   :  { %v462_v34 = vadd.f32 %v657_v33, %v357_v18 }
 0x218   :  { %v453_v36 = vpop.f32.mrf.mxu1 }
 0x219   :  { %518 = vst [vmem:[#allocation10 + $0x10] sm:$0xff] %v462_v34  ;;  %v454_v37 = vadd.f32 %v453_v36, %v355_v35 }
 0x21a   :  { %v658_v39 = vpop.f32.mrf.mxu1 }
 0x21b   :  { %516 = vst [vmem:[#allocation10] sm:$0xff] %v454_v37  ;;  %v465_v40 = vadd.f32 %v658_v39, %v358_v38 }
 0x21c   :  { %v456_v42 = vpop.f32.mrf.mxu1 }
 0x21d   :  { %519 = vst [vmem:[#allocation10 + $0x18] sm:$0xff] %v465_v40  ;;  %v457_v45 = vadd.f32 %v456_v42, %v356_v41 }
 0x21e   :  { %v661_v47 = vpop.f32.mrf.mxu1 }
 0x21f   :  { %517 = vst [vmem:[#allocation10 + $0x8] sm:$0xff] %v457_v45  ;;  %v478_v50 = vadd.f32 %v661_v47, %v361_v46 }
 0x220   :  { %v469_v53 = vpop.f32.mrf.mxu1 }
 0x221   :  { %522 = vst [vmem:[#allocation10 + $0x30] sm:$0xff] %v478_v50  ;;  %v470_v54 = vadd.f32 %v469_v53, %v359_v51 }
 0x222   :  { %v662_v57 = vpop.f32.mrf.mxu1 }
 0x223   :  { %520 = vst [vmem:[#allocation10 + $0x20] sm:$0xff] %v470_v54  ;;  %v481_v58 = vadd.f32 %v662_v57, %v362_v55 }
 0x224   :  { %v472_v60 = vpop.f32.mrf.mxu1 }
 0x225   :  { %523 = vst [vmem:[#allocation10 + $0x38] sm:$0xff] %v481_v58  ;;  %v473_v62 = vadd.f32 %v472_v60, %v360_v59 }
 0x226   :  { %v665_v1 = vpop.f32.mrf.mxu1 }
 0x227   :  { %521 = vst [vmem:[#allocation10 + $0x28] sm:$0xff] %v473_v62  ;;  %v494_v3 = vadd.f32 %v665_v1, %v365_v63 }
 0x228   :  { %v485_v5 = vpop.f32.mrf.mxu1 }
 0x229   :  { %526 = vst [vmem:[#allocation10 + $0x50] sm:$0xff] %v494_v3  ;;  %v486_v6 = vadd.f32 %v485_v5, %v363_v4 }
 0x22a   :  { %v666_v7 = vpop.f32.mrf.mxu1 }
 0x22b   :  { %524 = vst [vmem:[#allocation10 + $0x40] sm:$0xff] %v486_v6  ;;  %v497_v8 = vadd.f32 %v666_v7, %v366_v2 }
 0x22c   :  { %v488_v10 = vpop.f32.mrf.mxu1 }
 0x22d   :  { %527 = vst [vmem:[#allocation10 + $0x58] sm:$0xff] %v497_v8  ;;  %v489_v11 = vadd.f32 %v488_v10, %v364_v9 }
 0x22e   :  { %v669_v12 = vpop.f32.mrf.mxu1 }
 0x22f   :  { %525 = vst [vmem:[#allocation10 + $0x48] sm:$0xff] %v489_v11  ;;  %v510_v13 = vadd.f32 %v669_v12, %v369_v56 }
 0x230   :  { %v501_v14 = vpop.f32.mrf.mxu1 }
 0x231   :  { %530 = vst [vmem:[#allocation10 + $0x70] sm:$0xff] %v510_v13  ;;  %v502_v15 = vadd.f32 %v501_v14, %v367_v0 }
 0x232   :  { %v670_v16 = vpop.f32.mrf.mxu1 }
 0x233   :  { %528 = vst [vmem:[#allocation10 + $0x60] sm:$0xff] %v502_v15  ;;  %v513_v61 = vadd.f32 %v670_v16, %v370_v52 }
 0x234   :  { %v504_v21 = vpop.f32.mrf.mxu1 }
 0x235   :  { %531 = vst [vmem:[#allocation10 + $0x78] sm:$0xff] %v513_v61  ;;  %v505_v43 = vadd.f32 %v504_v21, %v368_v23 }
 0x237   :  { %529 = vst [vmem:[#allocation10 + $0x68] sm:$0xff] %v505_v43 }
 0x238   :  { %795 = shalt.err (!%p792_p10)
}
 0x239   :  { %543 = dma.vmem_to_hbm [thread:$0]  %s538_s3, 2048, %s926_s4, [#allocation4], %s813_s18, %s813_s18, %s814_s19  }
 0x23a   :  { %810 = dma.done.wait [#allocation4], 2048  }
 0x23b   :  { %811 = vsyncadd [#allocation4], 4294965248 }
 0x23c   :  { %547 = vsyncpa [#allocation3], 1 }
 0x23d   :  { %548 = vsyncpa [#allocation6], 1 }
 0x23e   :  { %549 = vsyncpa [#allocation9], 1 }
 0x23f   :  { %550 = vsyncpa [#allocation4], 1 }

</bundles_post_ra>
